<compile_context>
chip_gen: v6e
topology: v6e:2x2x1
jax: 0.10.0
libtpu: 0.0.40
codegen_flags: <defaults>
</compile_context>

<pallas_src>
import functools

import numpy as np
import jax
import jax.numpy as jnp
from jax.experimental import pallas as pl
from jax.experimental.pallas import tpu as pltpu


def _bilinear_matrix(out_size, in_size):
    """PyTorch-compatible bilinear interpolation matrix (align_corners=False)."""
    scale = in_size / out_size
    i = np.arange(out_size, dtype=np.float64)
    src = (i + 0.5) * scale - 0.5
    src = np.maximum(src, 0.0)  # PyTorch clamps negative source coords to 0
    i0 = np.minimum(np.floor(src).astype(np.int64), in_size - 1)
    i1 = np.minimum(i0 + 1, in_size - 1)
    lam1 = src - i0
    lam0 = 1.0 - lam1
    m = np.zeros((out_size, in_size), dtype=np.float64)
    m[np.arange(out_size), i0] += lam0
    m[np.arange(out_size), i1] += lam1
    return m


def calculate_class_weights(labels):
    """Same math as the PyTorch helper, on host numpy (deterministic glue)."""
    labels = np.asarray(labels, dtype=np.float64)
    total = labels.size
    pos = float(labels.sum())
    neg = total - pos
    pos_w = neg / (pos + 1e-6)
    neg_w = pos / (neg + 1e-6)
    return np.array([neg_w, pos_w], dtype=np.float32)


def _pick_batch_block(n, hw_out, vmem_budget_bytes=16 * 1024 * 1024):
    """Per-step batch B: big enough to be lane/step efficient, small enough that the
    f32 (B, H*W) temporaries (+ double-buffered label blocks) stay well inside the
    scoped-VMEM budget on all generations (v7x has only 64 MiB physical)."""
    bytes_per_sample = hw_out * 4 * 4  # ~4 live f32 copies of the upsampled plane
    cap = max(1, vmem_budget_bytes // bytes_per_sample)
    if n <= cap:
        return n
    # B must divide N and be a multiple of 8 (sublane rule) unless it equals N.
    top = (min(cap, n) // 8) * 8
    for b in range(top, 0, -8):
        if n % b == 0:
            return b
    return n  # TODO(synk): ragged batch tiling for awkward N


def _wbce_kernel(kt_ref, logits_ref, labels_ref, out_ref, *, pos_weight):
    x = logits_ref[...]                                   # (B, h*w)  bf16
    y = labels_ref[...].astype(jnp.float32)               # (B, H*W)  cast AFTER the DMA
    # bilinear upsample of both spatial axes in one lane-dense MXU matmul, f32 acc
    up = jnp.dot(x, kt_ref[...], preferred_element_type=jnp.float32)   # (B, H*W) f32
    # numerically-stable weighted BCE-with-logits (PyTorch pos_weight semantics):
    #   loss = (1-y)*x + (1 + (pw-1)*y) * softplus(-x)
    log_w = 1.0 + (pos_weight - 1.0) * y
    sp = jnp.maximum(-up, 0.0) + jnp.log1p(jnp.exp(-jnp.abs(up)))
    loss = (1.0 - y) * up + log_w * sp
    out_ref[0, 0] = jnp.sum(loss)                         # per-block partial sum


def weighted_bce_with_logits_loss(logits, labels, pos_weight):
    """logits: (N, 1, h, w) float; labels: (N, H, W) any (narrow) dtype with {0,1}
    values; pos_weight: python float.  Returns the scalar mean weighted BCE loss."""
    N, C, h, w = logits.shape
    assert C == 1
    H, W = int(labels.shape[-2]), int(labels.shape[-1])
    hw, HW = h * w, H * W

    # kron(Wh, Ww)^T : (h*w, H*W), bf16 MXU operand, resident in VMEM for all steps.
    kt_np = np.kron(_bilinear_matrix(H, h), _bilinear_matrix(W, w)).T
    kt = jnp.asarray(kt_np, dtype=jnp.bfloat16)

    logits_flat = jnp.reshape(logits, (N, hw)).astype(jnp.bfloat16)   # small array
    labels_flat = jnp.reshape(labels, (N, HW))                        # keep narrow dtype

    B = _pick_batch_block(N, HW)
    assert N % B == 0
    G = N // B
    inv_count = 1.0 / float(N * HW)

    kernel = functools.partial(_wbce_kernel, pos_weight=float(pos_weight))

    partials = pl.pallas_call(
        kernel,
        out_shape=jax.ShapeDtypeStruct((G, 1), jnp.float32),
        grid_spec=pltpu.PrefetchScalarGridSpec(
            num_scalar_prefetch=0,
            grid=(G,),
            in_specs=[
                pl.BlockSpec((hw, HW), lambda g: (0, 0)),   # kron operator (resident)
                pl.BlockSpec((B, hw), lambda g: (g, 0)),    # logits block (bf16)
                pl.BlockSpec((B, HW), lambda g: (g, 0)),    # labels block (narrow dtype)
            ],
            out_specs=pl.BlockSpec((1, 1), lambda g: (g, 0),
                                   memory_space=pltpu.SMEM),
        ),
        compiler_params=pltpu.CompilerParams(
            dimension_semantics=("parallel",),              # disjoint partials -> 2 TCs on v7x
            vmem_limit_bytes=32 * 1024 * 1024),
    )(kt, logits_flat, labels_flat)

    return jnp.sum(partials) * inv_count                    # mean reduction in the wrapper


if __name__ == "__main__":
    key = jax.random.PRNGKey(0)
    k1, k2 = jax.random.split(key)

    # small shapes consistent with the module: model logits at 8x8, labels at 16x16
    N, h, w = 2, 8, 8
    H, W = 16, 16
    logits = jax.random.normal(k1, (N, 1, h, w), dtype=jnp.float32)
    mask = jax.random.uniform(k2, (N, H, W)) > 0.7          # binary segmentation mask
    labels = mask.astype(jnp.bfloat16)                      # narrow storage dtype for the DMA

    # class weights computed from the (synthetic) labels, as in train.py
    weights = calculate_class_weights(np.asarray(jax.device_get(mask), dtype=np.float32))
    # TODO(synk): train.py passes the full [neg_w, pos_w] vector as pos_weight, which only
    # broadcasts in PyTorch if the last label dim is 2; we use the positive-class scalar
    # weight (standard BCEWithLogitsLoss pos_weight semantics).
    pos_weight = float(weights[1])

    loss = weighted_bce_with_logits_loss(logits, labels, pos_weight)
    jax.block_until_ready(loss)
    print("KERNEL_OK")
</pallas_src>

<mosaic_0001>
module attributes {stable_mosaic.version = 11 : i64} {
  func.func @_wbce_kernel(%arg0: i32, %arg1: memref<64x256xbf16, #tpu.memory_space<vmem>>, %arg2: memref<2x64xbf16, #tpu.memory_space<vmem>>, %arg3: memref<2x256xbf16, #tpu.memory_space<vmem>>, %arg4: memref<1x1xf32, #tpu.memory_space<smem>>) attributes {dimension_semantics = [#tpu.dimension_semantics<parallel>], iteration_bounds = array<i64: 1>, scalar_prefetch = 0 : i64, scratch_operands = 0 : i64, tpu.core_type = #tpu.core_type<tc>, window_params = [{pipeline_mode = #tpu.pipeline_mode<synchronous>, transform_indices = @transform_0, window_bounds = array<i64: 64, 256>}, {transform_indices = @transform_1, window_bounds = array<i64: 2, 64>}, {transform_indices = @transform_2, window_bounds = array<i64: 2, 256>}, {transform_indices = @transform_3, window_bounds = array<i64: 1, 1>}]} {
    %c0 = arith.constant 0 : index
    %c0_0 = arith.constant 0 : index
    %0 = vector.load %arg2[%c0, %c0_0] : memref<2x64xbf16, #tpu.memory_space<vmem>>, vector<2x64xbf16>
    %c0_1 = arith.constant 0 : index
    %c0_2 = arith.constant 0 : index
    %1 = vector.load %arg3[%c0_1, %c0_2] : memref<2x256xbf16, #tpu.memory_space<vmem>>, vector<2x256xbf16>
    %2 = arith.extf %1 : vector<2x256xbf16> to vector<2x256xf32>
    %c0_3 = arith.constant 0 : index
    %c0_4 = arith.constant 0 : index
    %3 = vector.load %arg1[%c0_3, %c0_4] : memref<64x256xbf16, #tpu.memory_space<vmem>>, vector<64x256xbf16>
    %cst = arith.constant dense<0.000000e+00> : vector<2x256xf32>
    %4 = tpu.matmul %0, %3, %cst {dimension_numbers = #tpu.dot_dimension_numbers<[1], [0], [0], [1], [0, 0, 1, 1], [], []>} : vector<2x64xbf16>, vector<64x256xbf16>, vector<2x256xf32> -> vector<2x256xf32>
    %cst_5 = arith.constant 1.58041954 : f32
    %5 = vector.broadcast %cst_5 : f32 to vector<2x256xf32>
    %6 = arith.mulf %5, %2 : vector<2x256xf32>
    %cst_6 = arith.constant 1.000000e+00 : f32
    %7 = vector.broadcast %cst_6 : f32 to vector<2x256xf32>
    %8 = arith.addf %7, %6 : vector<2x256xf32>
    %cst_7 = arith.constant 0.000000e+00 : f32
    %9 = vector.broadcast %cst_7 : f32 to vector<2x256xf32>
    %10 = arith.subf %9, %4 : vector<2x256xf32>
    %cst_8 = arith.constant 0.000000e+00 : f32
    %11 = vector.broadcast %cst_8 : f32 to vector<2x256xf32>
    %12 = arith.maximumf %10, %11 : vector<2x256xf32>
    %13 = math.absf %4 : vector<2x256xf32>
    %cst_9 = arith.constant 0.000000e+00 : f32
    %14 = vector.broadcast %cst_9 : f32 to vector<2x256xf32>
    %15 = arith.subf %14, %13 : vector<2x256xf32>
    %16 = math.exp %15 : vector<2x256xf32>
    %17 = math.log1p %16 : vector<2x256xf32>
    %18 = arith.addf %12, %17 : vector<2x256xf32>
    %cst_10 = arith.constant 1.000000e+00 : f32
    %19 = vector.broadcast %cst_10 : f32 to vector<2x256xf32>
    %20 = arith.subf %19, %2 : vector<2x256xf32>
    %21 = arith.mulf %20, %4 : vector<2x256xf32>
    %22 = arith.mulf %8, %18 : vector<2x256xf32>
    %23 = arith.addf %21, %22 : vector<2x256xf32>
    %24 = vector.shape_cast %23 : vector<2x256xf32> to vector<1x2x256xf32>
    %cst_11 = arith.constant dense<0.000000e+00> : vector<1xf32>
    %25 = vector.multi_reduction <add>, %24, %cst_11 [1, 2] : vector<1x2x256xf32> to vector<1xf32>
    %26 = vector.shape_cast %25 : vector<1xf32> to vector<1x1x1xf32>
    %27 = vector.extract %26[0, 0, 0] : f32 from vector<1x1x1xf32>
    %c0_12 = arith.constant 0 : index
    %c0_13 = arith.constant 0 : index
    %28 = memref.load %arg4[%c0_12, %c0_13] : memref<1x1xf32, #tpu.memory_space<smem>>
    memref.store %27, %arg4[%c0_12, %c0_13] : memref<1x1xf32, #tpu.memory_space<smem>>
    return
  }
  func.func @transform_0(%arg0: i32) -> (i32, i32) {
    %c0_i32 = arith.constant 0 : i32
    %c0_i32_0 = arith.constant 0 : i32
    %c0_i32_1 = arith.constant 0 : i32
    return %c0_i32, %c0_i32_0 : i32, i32
  }
  func.func @transform_1(%arg0: i32) -> (i32, i32) {
    %c0_i32 = arith.constant 0 : i32
    %c0_i32_0 = arith.constant 0 : i32
    return %arg0, %c0_i32 : i32, i32
  }
  func.func @transform_2(%arg0: i32) -> (i32, i32) {
    %c0_i32 = arith.constant 0 : i32
    %c0_i32_0 = arith.constant 0 : i32
    return %arg0, %c0_i32 : i32, i32
  }
  func.func @transform_3(%arg0: i32) -> (i32, i32) {
    %c0_i32 = arith.constant 0 : i32
    %c0_i32_0 = arith.constant 0 : i32
    return %arg0, %c0_i32 : i32, i32
  }
}

</mosaic_0001>

<bundles_post_ra>
// kernel: tpu_custom_call.1
= control target key start
LH: loop header
LB: loop body
LE: loop exit
PB: predicated region body
PF: predicated region fallthrough
CT: control target
= control target key end

     0   :  { %8 = vsyncpa [#allocation3], 0  ;;  %s333_s0 = inlined_call_operand.hbm [shape: bf16[64,256], index: 0, kind: input, shape index: {}]   ;;  %s334_s1 = inlined_call_operand.vmem [shape: bf16[2,64], index: 1, kind: input, shape index: {}]   ;;  %s335_s2 = inlined_call_operand.vmem [shape: bf16[2,256], index: 2, kind: input, shape index: {}]   ;;  %s336_s3 = inlined_call_operand.hbm [shape: f32[1,1], index: 3, kind: output, shape index: {}]  }
   0x1   :  { %9 = vsyncpa [#allocation4], 0  ;;  %s295_s12 = smov [#allocation2]  }
   0x2   :  { %s15_s13 = sshll.u32 %s295_s12, 4  ;;  %s16_s13 = int_to_ptr.vmem [resolvable:$true] %s15_s13 }
   0x3   :  { %s271_s14 = scalar_lea.vmem %s16_s13, 1024  ;;  %p276_p1 = scmp.lt.s32.totalorder %s16_s13, %s16_s13 }
   0x4   :  { %p272_p0 = scmp.ne.s32.totalorder %s16_s13, %s271_s14  ;;  %p277_p2 = scmp.lt.s32.totalorder %s271_s14, %s271_s14 }
   0x6   :  { %p278_p3 = por %p277_p2, %p276_p1 }
   0x8   :  { %p279_p4 = pnand %p278_p3, %p272_p0 }
   0xa   :  { %282 = shalt.err (!%p279_p4)
}
   0xb   :  { %s296_s15 = smov 128   ;;  %s297_s16 = smov 8  }
   0xc   :  { %21 = dma.hbm_to_vmem [thread:$0]  %s333_s0, 1024, %s16_s13, [#allocation3], %s296_s15, %s296_s15, %s297_s16  }
   0xd   :  { %291 = dma.done.wait [#allocation3], 1024  }
   0xe   :  { %292 = vsyncadd [#allocation3], 4294966272  ;;  %v298_v0 = vmov 0   ;;  %v243_v1 = vld [vmem:[#allocation2 + $0x34] ss:$8 sps:$4 sm:$0xff]   ;;  %vm81_vm0 = vcmask 523264   ;;  %v167_v27 = vlaneseq }
   0xf   :  { %117 = vmatprep.mubr.bf16.mxu0 %v298_v0  ;;  %v245_v2 = vld [vmem:[#allocation2 + $0x30] ss:$8 sps:$4 sm:$0xff]   ;;  %93 = vmatprep.subr.bf16.mxu0 %v243_v1  ;;  %v246_v3 = vld [vmem:[#allocation2 + $0x24] ss:$8 sps:$4 sm:$0xff]   ;;  %v248_v4 = vld [vmem:[#allocation2 + $0x20] ss:$8 sps:$4 sm:$0xff]  }
  0x10   :  { %94 = vmatpush1.bf16.msra.mxu0 %v245_v2  ;;  %v249_v5 = vld [vmem:[#allocation2 + $0x14] ss:$8 sps:$4 sm:$0xff]   ;;  %v251_v6 = vld [vmem:[#allocation2 + $0x10] ss:$8 sps:$4 sm:$0xff]   ;;  %v252_v7 = vld [vmem:[#allocation2 + $0x4] ss:$8 sps:$4 sm:$0xff]  }
  0x11   :  { %95 = vmatprep.subr.bf16.mxu0 %v246_v3  ;;  %v254_v8 = vld [vmem:[#allocation2] ss:$8 sps:$4 sm:$0xff]   ;;  %v299_v25 = vmov 1983009808   ;;  %v168_v32 = vshrl.u32 %v167_v27, 7  ;;  %vm197_vm3 = vcmask 1041408  }
  0x12   :  { %v30_v9 = vld [vmem:[%s334_s1] sm:$0x1]  ;;  %v165_v26 = vunpack.c.l.s4 %v299_v25  ;;  %s300_s21 = smov [#allocation5]  }
  0x13   :  { %v31_v33 = vld [vmem:[%s335_s2] sm:$0x3] }
  0x14   :  { %96 = vmatpush1.bf16.msra.mxu0 %v248_v4  ;;  %v166_v31 = vunpack.c.0.s8 %v165_v26  ;;  %v32_v41 = vunpack.c.l.bf16 %v31_v33 }
  0x15   :  { %97 = vmatprep.subr.bf16.mxu0 %v249_v5 }
  0x16   :  { %v169_v43 = vsub.s32 %v166_v31, %v168_v32  ;;  %v126_v47 = vmul.f32 1.5804195, %v32_v41  ;;  %v160_v57 = vsub.f32 1.0, %v32_v41 }
  0x18   :  { %98 = vmatpush1.bf16.msra.mxu0 %v251_v6  ;;  %v127_v56 = vadd.f32 1.0, %v126_v47 }
  0x19   :  { %99 = vmatprep.subr.bf16.mxu0 %v252_v7 }
  0x1c   :  { %100 = vmatpush1.bf16.msra.mxu0 %v254_v8 }
  0x1f   :  { %234 = vmatmul.mubr.msk.bf16.vlgmr.msra.gmra.mxu0 %vm81_vm0, %v30_v9 }
  0xdf   :  { %v119_v10 = vpop.f32.mrf.mxu0 }
  0xe0   :  { %v132_v11 = vand.u32 2147483647, %v119_v10  ;;  %v128_v36 = vsub.f32 0.0, %v119_v10 }
  0xe1   :  { %v121_v12 = vpop.f32.mrf.mxu0 }
  0xe2   :  { %v134_v13 = vsub.f32 0.0, %v132_v11  ;;  %v133_v14 = vand.u32 2147483647, %v121_v12  ;;  %v129_v37 = vsub.f32 0.0, %v121_v12  ;;  %v130_v48 = vmax.f32 %v128_v36, 0.0 }
  0xe3   :  { %v123_v15 = vpop.f32.mrf.mxu0  ;;  %v163_v50 = vcombine.low %v119_v10, %v121_v12 }
  0xe4   :  { %v136_v16 = vmul.f32 1.442695, %v134_v13  ;;  %v135_v17 = vsub.f32 0.0, %v133_v14  ;;  %v131_v49 = vmax.f32 %v129_v37, 0.0 }
  0xe5   :  { %v124_v18 = vpop.f32.mrf.mxu0  ;;  %v170_v54 = vrot.slane %v163_v50, %v169_v43 }
  0xe6   :  { %255 = vpow2.f32 %v136_v16  ;;  %v138_v19 = vmul.f32 1.442695, %v135_v17 }
  0xe7   :  { %v172_v59 = vmul.f32 %v170_v54, %v160_v57 }
  0xe8   :  { %257 = vpow2.f32 %v138_v19 }
  0xf3   :  { %v256_v20 = vpop.eup %255 }
  0xf4   :  { %v140_v21 = vadd.f32 1.0, %v256_v20  ;;  %v143_v24 = vmul.f32 -0.5, %v256_v20  ;;  %v146_v30 = vand.u32 2147483647, %v256_v20 }
  0xf5   :  { %v258_v22 = vpop.eup %257 }
  0xf6   :  { %259 = vlog2.f32 %v140_v21  ;;  %v149_v23 = vadd.f32 1.0, %v258_v22  ;;  %v152_v28 = vmul.f32 -0.5, %v258_v22  ;;  %v144_v29 = vadd.f32 1.0, %v143_v24 }
  0xf7   :  { %v155_v38 = vand.u32 2147483647, %v258_v22  ;;  %vm147_vm1 = vcmp.lt.f32.partialorder %v146_v30, 0.0004427343 }
  0xf8   :  { %261 = vlog2.f32 %v149_v23  ;;  %v153_v34 = vadd.f32 1.0, %v152_v28  ;;  %v145_v40 = vmul.f32 %v256_v20, %v144_v29 }
  0xf9   :  { %vm156_vm2 = vcmp.lt.f32.partialorder %v155_v38, 0.0004427343 }
  0xfa   :  { %v154_v46 = vmul.f32 %v258_v22, %v153_v34 }
 0x103   :  { %v260_v35 = vpop.eup %259 }
 0x104   :  { %v142_v39 = vmul.f32 0.6931472, %v260_v35 }
 0x105   :  { %v262_v42 = vpop.eup %261 }
 0x106   :  { %v148_v44 = vsel %vm147_vm1, %v145_v40, %v142_v39  ;;  %v151_v45 = vmul.f32 0.6931472, %v262_v42 }
 0x107   :  { %v158_v52 = vadd.f32 %v148_v44, %v130_v48 }
 0x108   :  { %v157_v51 = vsel %vm156_vm2, %v154_v46, %v151_v45 }
 0x109   :  { %v159_v53 = vadd.f32 %v157_v51, %v131_v49 }
 0x10b   :  { %v175_v55 = vcombine.low %v158_v52, %v159_v53 }
 0x10d   :  { %v182_v58 = vrot.slane %v175_v55, %v169_v43 }
 0x10f   :  { %v184_v60 = vmul.f32 %v182_v58, %v127_v56 }
 0x111   :  { %v185_v61 = vadd.f32 %v184_v60, %v172_v59 }
 0x113   :  { %v193_v62 = vrot.slane %v185_v61, %v169_v43 }
 0x115   :  { %v194_v63 = vcombine.high %v193_v62, %v193_v62  ;;  %v198_v0 = vsel %vm197_vm3, %v193_v62, 0.0 }
 0x117   :  { %v199_v1 = vsel %vm197_vm3, %v194_v63, 0.0 }
 0x118   :  { %v200_v2 = vadd.f32 %v199_v1, %v198_v0 }
 0x11a   :  { %201 = vadd.xlane.f32.xlu0 %v200_v2 }
 0x1a3   :  { %v202_v3 = vpop.xlane.xlu0 %201 }
 0x1a4   :  { %v203_v4 = vrot.slane %v202_v3, 4 }
 0x1a6   :  { %v204_v5 = vadd.f32 %v203_v4, %v202_v3 }
 0x1a8   :  { %v205_v6 = vrot.slane %v204_v5, 2 }
 0x1aa   :  { %v206_v7 = vadd.f32 %v205_v6, %v204_v5 }
 0x1ac   :  { %v207_v8 = vrot.slane %v206_v7, 1 }
 0x1ae   :  { %v208_v9 = vadd.f32 %v207_v8, %v206_v7 }
 0x1b0   :  { %235 = vpush %v208_v9 }
 0x1e1   :  { %s236_s2 = spop %235 }
 0x1e2   :  { %211 = sst [smem:[#allocation5]] %s236_s2 }
 0x1e3   :  { %219 = dma.smem_to_hbm %s300_s21, 16, %s336_s3, [#allocation4]  }
 0x1e4   :  { %293 = dma.done.wait [#allocation4], 16  }
 0x1e5   :  { %294 = vsyncadd [#allocation4], 4294967280 }
 0x1e6   :  { %223 = sfence }
 0x1e7   :  { %224 = vsyncpa [#allocation3], 1 }
 0x1e8   :  { %225 = vsyncpa [#allocation4], 1 }

</bundles_post_ra>
